<compile_context>
chip_gen: v7x
topology: tpu7x:2x2x1
jax: 0.10.0
libtpu: 0.0.40
codegen_flags: <defaults>
</compile_context>

<pallas_src>
import functools
import math

import jax
import jax.numpy as jnp
from jax.experimental import pallas as pl
from jax.experimental.pallas import tpu as pltpu


def _round_up(n, m):
    return ((n + m - 1) // m) * m


def _apply_act(y, act):
    if act == "relu":
        return jnp.maximum(y, 0.0)
    if act == "tanh":
        return jnp.tanh(y)
    if act == "sigmoid":
        return jax.nn.sigmoid(y)
    return y  # 'linear' -> identity


def _fused_mlp_kernel(*refs, act, n_layers):
    """Whole MLP in one kernel: h = act(h @ W_l + b_l), l = 0..n_layers-1.

    refs = (x_ref, w0, b0, w1, b1, ..., o_ref).
    x and the inter-layer h are bf16 (MXU operands); bias add, activation and
    accumulation are f32; only the final store is f32.  All feature dims are
    zero-padded to multiples of 128 (lane-dense), and padded weight rows/cols
    are zero so padded lanes never leak into real outputs (even when sigmoid
    turns padded lanes into 0.5, the next layer's zero weight rows kill it).
    """
    x_ref = refs[0]
    o_ref = refs[-1]
    wb = refs[1:-1]
    h = x_ref[...]                                           # bf16 (TB, in_pad)
    for l in range(n_layers):
        w = wb[2 * l][...]                                   # bf16 (in_p, out_p)
        b = wb[2 * l + 1][...]                               # f32  (1, out_p)
        y = jnp.dot(h, w, preferred_element_type=jnp.float32) + b
        a = _apply_act(y, act)                               # f32
        if l + 1 < n_layers:
            h = a.astype(jnp.bfloat16)                       # stream bf16
        else:
            o_ref[...] = a.astype(o_ref.dtype)               # final store f32


class MyLittleModelPallas:
    """JAX/Pallas port of MyLittleModel (stack of Linear + activation)."""

    _SMALL_BATCH = 1024                       # below this: no grid, all resident
    _TILE_CANDIDATES = (2048, 1024, 512, 256, 128)

    def __init__(self, parameters, n_features, n_classes, act="linear", key=None):
        self.act = act
        self.n_features = n_features
        self.n_classes = n_classes
        inp = list(parameters)
        inp.insert(0, n_features)
        out = list(parameters)
        out.append(n_classes)
        dims = list(zip(inp, out))
        if key is None:
            key = jax.random.PRNGKey(0)

        # deterministic init mimicking torch.nn.Linear's uniform bound (f32)
        w_t_f32 = []   # pre-transposed (in_f, out_f)
        b_raw = []
        for in_f, out_f in dims:
            key, kw, kb = jax.random.split(key, 3)
            bound = 1.0 / math.sqrt(in_f)
            w = jax.random.uniform(kw, (out_f, in_f), jnp.float32, -bound, bound)
            b = jax.random.uniform(kb, (out_f,), jnp.float32, -bound, bound)
            w_t_f32.append(w.T)
            b_raw.append(b)

        # act == 'linear': fold the whole chain into one layer (in f32, cast once)
        if act == "linear" and len(dims) > 1:
            Wf = w_t_f32[0]
            bf = b_raw[0]
            for l in range(1, len(dims)):
                bf = bf @ w_t_f32[l] + b_raw[l]
                Wf = Wf @ w_t_f32[l]
            w_t_f32 = [Wf]
            b_raw = [bf]
            dims = [(n_features, n_classes)]
        self.dims = dims

        # pad feature dims to multiples of 128 (lane-dense), cast weights to bf16
        self.w_bf16 = []   # (in_pad, out_pad) bf16
        self.b_f32 = []    # (1, out_pad)      f32
        for (in_f, out_f), wt, b in zip(dims, w_t_f32, b_raw):
            in_p = _round_up(in_f, 128)
            out_p = _round_up(out_f, 128)
            wp = jnp.zeros((in_p, out_p), jnp.float32).at[:in_f, :out_f].set(wt)
            bp = jnp.zeros((1, out_p), jnp.float32).at[0, :out_f].set(b)
            self.w_bf16.append(wp.astype(jnp.bfloat16))
            self.b_f32.append(bp)

        self.n_layers = len(self.w_bf16)
        self.in_pad = self.w_bf16[0].shape[0]
        self.out_pad = self.w_bf16[-1].shape[1]
        self.max_pad = max([self.in_pad] + [w.shape[1] for w in self.w_bf16])

        self._flat_params = []
        for w, b in zip(self.w_bf16, self.b_f32):
            self._flat_params += [w, b]

        self._kernel = functools.partial(
            _fused_mlp_kernel, act=act, n_layers=self.n_layers)

        # VMEM capacity (generation-aware: 64 MiB/TC on v7x, 128 MiB on v5e/v6e)
        try:
            info = pltpu.get_tpu_info()
            cap = int(getattr(info, "vmem_capacity_bytes", 0)) or (64 << 20)
        except Exception:
            cap = 64 << 20
        self._vmem_cap = cap

        # Guard: the all-weights-resident fused strategy must fit VMEM.
        w_resident = (sum(int(w.size) * 2 for w in self.w_bf16)
                      + sum(int(b.size) * 4 for b in self.b_f32))
        if 2 * w_resident > int(0.7 * cap):
            # TODO(synk): fall back to per-layer weight streaming via
            # pltpu.emit_pipeline when the layer stack no longer fits VMEM.
            raise NotImplementedError(
                "weight stack too large for the VMEM-resident fused kernel")

        self._fwd = jax.jit(self._forward)

    # ------------------------------------------------------------------ #
    def _vmem_bytes(self, batch_tile):
        """Conservative VMEM footprint estimate for one pipelined step."""
        wbytes = sum(int(w.size) * 2 for w in self.w_bf16)
        bbytes = sum(int(b.size) * 4 for b in self.b_f32)
        xbytes = batch_tile * self.in_pad * 2          # bf16 input tile
        obytes = batch_tile * self.out_pad * 4         # f32 output tile
        inter = batch_tile * self.max_pad * 8          # f32 y + bf16 h headroom
        # 2x: weights/biases may be double-buffered (constant index_map) and
        # the IO tiles are double-buffered by the pipeline.
        return 2 * (wbytes + bbytes + xbytes + obytes) + inter

    def _pick_tile(self, B):
        """Largest batch tile with <=12.5% pad waste, >=2 grid steps, VMEM fit."""
        tb = 128
        for cand in self._TILE_CANDIDATES:
            b_pad = _round_up(B, cand)
            if b_pad // cand >= 2 and (b_pad - B) * 8 <= B:
                tb = cand
                break
        while tb > 128 and self._vmem_bytes(tb) > int(0.8 * self._vmem_cap):
            tb //= 2
        return tb

    def _vmem_limit(self, batch_tile):
        need = int(1.25 * self._vmem_bytes(batch_tile)) + (4 << 20)
        return int(min(max(need, 32 << 20), self._vmem_cap - (8 << 20)))

    # ------------------------------------------------------------------ #
    def _forward(self, x, *params):
        """x: (B, n_features) f32/bf16. Pads + casts, runs fused kernel, un-pads."""
        B, F = x.shape
        if B <= self._SMALL_BATCH:
            # Tiny batch: no grid, whole problem resident in VMEM.
            B_pad = _round_up(max(B, 16), 16)
            x_pad = jnp.pad(x.astype(jnp.bfloat16),
                            ((0, B_pad - B), (0, self.in_pad - F)))
            call = pl.pallas_call(
                self._kernel,
                out_shape=jax.ShapeDtypeStruct((B_pad, self.out_pad), jnp.float32),
                in_specs=[pl.BlockSpec(memory_space=pltpu.MemorySpace.VMEM)]
                         * (1 + len(params)),
                out_specs=pl.BlockSpec(memory_space=pltpu.MemorySpace.VMEM),
                compiler_params=pltpu.CompilerParams(
                    vmem_limit_bytes=self._vmem_limit(B_pad)),
            )
        else:
            # Large batch: batch-tiled grid (>=2 steps); weights stay resident,
            # axis is 'parallel' so v7x's two TensorCores split it.
            TB = self._pick_tile(B)
            B_pad = _round_up(B, TB)
            x_pad = jnp.pad(x.astype(jnp.bfloat16),
                            ((0, B_pad - B), (0, self.in_pad - F)))
            in_specs = [pl.BlockSpec((TB, self.in_pad), lambda i: (i, 0))]
            for w, b in zip(self.w_bf16, self.b_f32):
                # Constant index_map -> same block every step.  (Single-buffering
                # via pipeline_mode=pl.Buffered(1) is left off for lowering
                # robustness; the 2x weight bytes are budgeted in vmem_limit.)
                in_specs.append(pl.BlockSpec(w.shape, lambda i: (0, 0)))
                in_specs.append(pl.BlockSpec(b.shape, lambda i: (0, 0)))
            call = pl.pallas_call(
                self._kernel,
                out_shape=jax.ShapeDtypeStruct((B_pad, self.out_pad), jnp.float32),
                grid_spec=pltpu.PrefetchScalarGridSpec(
                    num_scalar_prefetch=0,
                    grid=(B_pad // TB,),
                    in_specs=in_specs,
                    out_specs=pl.BlockSpec((TB, self.out_pad), lambda i: (i, 0)),
                ),
                compiler_params=pltpu.CompilerParams(
                    dimension_semantics=("parallel",),
                    vmem_limit_bytes=self._vmem_limit(TB)),
            )
        out_pad = call(x_pad, *params)
        return out_pad[:B, :self.n_classes]

    # ------------------------------------------------------------------ #
    def __call__(self, x):
        assert x.shape[1] == self.n_features, (x.shape[1], self.n_features)
        return self._fwd(x, *self._flat_params)

    # pure-JAX reference with matching bf16-stream / f32-accumulate semantics
    def reference(self, x):
        B, F = x.shape
        h = jnp.pad(x.astype(jnp.bfloat16), ((0, 0), (0, self.in_pad - F)))
        out = None
        for l, (w, b) in enumerate(zip(self.w_bf16, self.b_f32)):
            y = jnp.dot(h, w, preferred_element_type=jnp.float32) + b
            a = _apply_act(y, self.act)
            if l + 1 < self.n_layers:
                h = a.astype(jnp.bfloat16)
            else:
                out = a
        return out[:, :self.n_classes]


if __name__ == "__main__":
    # MLP: n_features=32 -> hidden [64, 32] -> n_classes=16.
    n_features = 32
    parameters = [64, 32]
    n_classes = 16

    key = jax.random.PRNGKey(0)
    key, kx1, kx2 = jax.random.split(key, 3)
    x_small = jax.random.normal(kx1, (8, n_features), dtype=jnp.float32)
    x_big = jax.random.normal(kx2, (1500, n_features), dtype=jnp.float32)

    # relu model: small batch exercises the no-grid, fully VMEM-resident path.
    model_relu = MyLittleModelPallas(parameters, n_features, n_classes,
                                     act="relu", key=jax.random.PRNGKey(1))
    out_s = jax.block_until_ready(model_relu(x_small))
    ref_s = model_relu.reference(x_small)
    assert out_s.shape == (8, n_classes), out_s.shape
    assert jnp.allclose(out_s, ref_s, atol=1e-3, rtol=1e-3), \
        float(jnp.max(jnp.abs(out_s - ref_s)))

    # Same model, large batch: exercises the batch-tiled 'parallel' grid path
    # (adaptive tile -> TB=256, grid of 6 steps, <=12.5% pad waste).
    out_b = jax.block_until_ready(model_relu(x_big))
    ref_b = model_relu.reference(x_big)
    assert out_b.shape == (1500, n_classes), out_b.shape
    assert jnp.allclose(out_b, ref_b, atol=1e-3, rtol=1e-3), \
        float(jnp.max(jnp.abs(out_b - ref_b)))

    # linear model: exercises the folded single-matmul path.
    model_lin = MyLittleModelPallas(parameters, n_features, n_classes,
                                    act="linear", key=jax.random.PRNGKey(2))
    out_l = jax.block_until_ready(model_lin(x_small))
    ref_l = model_lin.reference(x_small)
    assert out_l.shape == (8, n_classes), out_l.shape
    assert jnp.allclose(out_l, ref_l, atol=1e-3, rtol=1e-3), \
        float(jnp.max(jnp.abs(out_l - ref_l)))

    print("KERNEL_OK")
</pallas_src>

<mosaic_0001>
module attributes {stable_mosaic.version = 11 : i64} {
  func.func @_fused_mlp_kernel(%arg0: memref<16x128xbf16, #tpu.memory_space<vmem>>, %arg1: memref<128x128xbf16, #tpu.memory_space<vmem>>, %arg2: memref<1x128xf32, #tpu.memory_space<vmem>>, %arg3: memref<128x128xbf16, #tpu.memory_space<vmem>>, %arg4: memref<1x128xf32, #tpu.memory_space<vmem>>, %arg5: memref<128x128xbf16, #tpu.memory_space<vmem>>, %arg6: memref<1x128xf32, #tpu.memory_space<vmem>>, %arg7: memref<16x128xf32, #tpu.memory_space<vmem>>) attributes {dimension_semantics = [], scalar_prefetch = 0 : i64, scratch_operands = 0 : i64, tpu.core_type = #tpu.core_type<tc>} {
    %c0 = arith.constant 0 : index
    %c0_0 = arith.constant 0 : index
    %0 = vector.load %arg0[%c0, %c0_0] : memref<16x128xbf16, #tpu.memory_space<vmem>>, vector<16x128xbf16>
    %c0_1 = arith.constant 0 : index
    %c0_2 = arith.constant 0 : index
    %1 = vector.load %arg1[%c0_1, %c0_2] : memref<128x128xbf16, #tpu.memory_space<vmem>>, vector<128x128xbf16>
    %c0_3 = arith.constant 0 : index
    %c0_4 = arith.constant 0 : index
    %2 = vector.load %arg2[%c0_3, %c0_4] : memref<1x128xf32, #tpu.memory_space<vmem>>, vector<1x128xf32>
    %cst = arith.constant dense<0.000000e+00> : vector<16x128xf32>
    %3 = tpu.matmul %0, %1, %cst {dimension_numbers = #tpu.dot_dimension_numbers<[1], [0], [0], [1], [0, 0, 1, 1], [], []>} : vector<16x128xbf16>, vector<128x128xbf16>, vector<16x128xf32> -> vector<16x128xf32>
    %4 = vector.broadcast %2 : vector<1x128xf32> to vector<16x128xf32>
    %5 = arith.addf %3, %4 : vector<16x128xf32>
    %cst_5 = arith.constant 0.000000e+00 : f32
    %6 = vector.broadcast %cst_5 : f32 to vector<16x128xf32>
    %7 = arith.maximumf %5, %6 : vector<16x128xf32>
    %8 = arith.truncf %7 : vector<16x128xf32> to vector<16x128xbf16>
    %c0_6 = arith.constant 0 : index
    %c0_7 = arith.constant 0 : index
    %9 = vector.load %arg3[%c0_6, %c0_7] : memref<128x128xbf16, #tpu.memory_space<vmem>>, vector<128x128xbf16>
    %c0_8 = arith.constant 0 : index
    %c0_9 = arith.constant 0 : index
    %10 = vector.load %arg4[%c0_8, %c0_9] : memref<1x128xf32, #tpu.memory_space<vmem>>, vector<1x128xf32>
    %cst_10 = arith.constant dense<0.000000e+00> : vector<16x128xf32>
    %11 = tpu.matmul %8, %9, %cst_10 {dimension_numbers = #tpu.dot_dimension_numbers<[1], [0], [0], [1], [0, 0, 1, 1], [], []>} : vector<16x128xbf16>, vector<128x128xbf16>, vector<16x128xf32> -> vector<16x128xf32>
    %12 = vector.broadcast %10 : vector<1x128xf32> to vector<16x128xf32>
    %13 = arith.addf %11, %12 : vector<16x128xf32>
    %cst_11 = arith.constant 0.000000e+00 : f32
    %14 = vector.broadcast %cst_11 : f32 to vector<16x128xf32>
    %15 = arith.maximumf %13, %14 : vector<16x128xf32>
    %16 = arith.truncf %15 : vector<16x128xf32> to vector<16x128xbf16>
    %c0_12 = arith.constant 0 : index
    %c0_13 = arith.constant 0 : index
    %17 = vector.load %arg5[%c0_12, %c0_13] : memref<128x128xbf16, #tpu.memory_space<vmem>>, vector<128x128xbf16>
    %c0_14 = arith.constant 0 : index
    %c0_15 = arith.constant 0 : index
    %18 = vector.load %arg6[%c0_14, %c0_15] : memref<1x128xf32, #tpu.memory_space<vmem>>, vector<1x128xf32>
    %cst_16 = arith.constant dense<0.000000e+00> : vector<16x128xf32>
    %19 = tpu.matmul %16, %17, %cst_16 {dimension_numbers = #tpu.dot_dimension_numbers<[1], [0], [0], [1], [0, 0, 1, 1], [], []>} : vector<16x128xbf16>, vector<128x128xbf16>, vector<16x128xf32> -> vector<16x128xf32>
    %20 = vector.broadcast %18 : vector<1x128xf32> to vector<16x128xf32>
    %21 = arith.addf %19, %20 : vector<16x128xf32>
    %cst_17 = arith.constant 0.000000e+00 : f32
    %22 = vector.broadcast %cst_17 : f32 to vector<16x128xf32>
    %23 = arith.maximumf %21, %22 : vector<16x128xf32>
    %c0_18 = arith.constant 0 : index
    %c0_19 = arith.constant 0 : index
    %24 = vector.load %arg7[%c0_18, %c0_19] : memref<16x128xf32, #tpu.memory_space<vmem>>, vector<16x128xf32>
    tpu.vector_store %arg7[%c0_18, %c0_19], %23 {strides = array<i32>} : memref<16x128xf32, #tpu.memory_space<vmem>>, vector<16x128xf32>,
    return
  }
}

</mosaic_0001>

<bundles_post_ra>
// kernel: _forward.1
= control target key start
LH: loop header
LB: loop body
LE: loop exit
PB: predicated region body
PF: predicated region fallthrough
CT: control target
= control target key end

     0   :  { %12 = vsyncpa [#allocation3], 0  ;;  %s792_s0 = inlined_call_operand.vmem [shape: bf16[16,128], index: 0, kind: input, shape index: {}]   ;;  %s793_s1 = inlined_call_operand.hbm [shape: bf16[128,128], index: 1, kind: input, shape index: {}]   ;;  %s794_s2 = inlined_call_operand.vmem [shape: f32[1,128], index: 2, kind: input, shape index: {}]   ;;  %s795_s3 = inlined_call_operand.hbm [shape: bf16[128,128], index: 3, kind: input, shape index: {}]   ;;  %s796_s4 = inlined_call_operand.vmem [shape: f32[1,128], index: 4, kind: input, shape index: {}]   ;;  %s797_s5 = inlined_call_operand.hbm [shape: bf16[128,128], index: 5, kind: input, shape index: {}]   ;;  %s798_s6 = inlined_call_operand.vmem [shape: f32[1,128], index: 6, kind: input, shape index: {}]   ;;  %s799_s7 = inlined_call_operand.vmem [shape: f32[16,128], index: 7, kind: output, shape index: {}]  }
   0x1   :  { %13 = vsyncpa [#allocation5], 0  ;;  %s645_s24 = smov [#allocation4]   ;;  %s646_s26 = smov [#allocation2]  }
   0x2   :  { %s35_s25 = sshll.u32 %s645_s24, 4  ;;  %s21_s27 = sshll.u32 %s646_s26, 4  ;;  %s36_s25 = int_to_ptr.vmem [resolvable:$true] %s35_s25  ;;  %s692_s27 = int_to_ptr.vmem [resolvable:$true] %s21_s27 }
   0x3   :  { %s575_s30 = scalar_lea.hbm %s795_s3, 1024 }
   0x4   :  { %p576_p0 = scmp.ne.s32.totalorder %s795_s3, %s575_s30  ;;  %p579_p1 = scmp.lt.u32.totalorder %s575_s30, %s795_s3 }
   0x6   :  { %p581_p2 = pnand %p579_p1, %p576_p0 }
   0x8   :  { %584 = shalt.err (!%p581_p2)
}
   0x9   :  { %s585_s12 = scalar_lea.vmem %s36_s25, 1024  ;;  %p590_p4 = scmp.lt.s32.totalorder %s36_s25, %s36_s25 }
   0xa   :  { %p586_p3 = scmp.ne.s32.totalorder %s36_s25, %s585_s12  ;;  %p591_p5 = scmp.lt.s32.totalorder %s585_s12, %s585_s12 }
   0xc   :  { %p592_p6 = por %p591_p5, %p590_p4 }
   0xe   :  { %p593_p7 = pnand %p592_p6, %p586_p3 }
  0x10   :  { %596 = shalt.err (!%p593_p7)
}
  0x11   :  { %s647_s13 = smov 64   ;;  %s648_s14 = smov 4  }
  0x12   :  { %41 = dma.hbm_to_vmem [thread:$0]  %s795_s3, 1024, %s36_s25, [#allocation5], %s647_s13, %s647_s13, %s648_s14  }
  0x13   :  { %s597_s19 = scalar_lea.hbm %s793_s1, 1024 }
  0x14   :  { %p598_p8 = scmp.ne.s32.totalorder %s793_s1, %s597_s19  ;;  %p601_p9 = scmp.lt.u32.totalorder %s597_s19, %s793_s1 }
  0x16   :  { %p603_p10 = pnand %p601_p9, %p598_p8 }
  0x18   :  { %606 = shalt.err (!%p603_p10)
}
  0x19   :  { %s607_s24 = scalar_lea.vmem %s692_s27, 1024  ;;  %p612_p12 = scmp.lt.s32.totalorder %s692_s27, %s692_s27 }
  0x1a   :  { %p608_p11 = scmp.ne.s32.totalorder %s692_s27, %s607_s24  ;;  %p613_p13 = scmp.lt.s32.totalorder %s607_s24, %s607_s24 }
  0x1c   :  { %p614_p0 = por %p613_p13, %p612_p12 }
  0x1e   :  { %p615_p1 = pnand %p614_p0, %p608_p11 }
  0x20   :  { %618 = shalt.err (!%p615_p1)
}
  0x21   :  { %27 = dma.hbm_to_vmem [thread:$0]  %s793_s1, 1024, %s692_s27, [#allocation3], %s647_s13, %s647_s13, %s648_s14  }
  0x22   :  { %s649_s26 = smov [#allocation6]   ;;  %s619_s8 = scalar_lea.hbm %s797_s5, 1024 }
  0x23   :  { %s49_s28 = sshll.u32 %s649_s26, 4  ;;  %p620_p2 = scmp.ne.s32.totalorder %s797_s5, %s619_s8  ;;  %s50_s28 = int_to_ptr.vmem [resolvable:$true] %s49_s28 }
  0x24   :  { %p623_p3 = scmp.lt.u32.totalorder %s619_s8, %s797_s5 }
  0x26   :  { %p625_p4 = pnand %p623_p3, %p620_p2 }
  0x28   :  { %628 = shalt.err (!%p625_p4)
}
  0x29   :  { %s629_s15 = scalar_lea.vmem %s50_s28, 1024  ;;  %p634_p6 = scmp.lt.s32.totalorder %s50_s28, %s50_s28 }
  0x2a   :  { %p630_p5 = scmp.ne.s32.totalorder %s50_s28, %s629_s15  ;;  %p635_p7 = scmp.lt.s32.totalorder %s629_s15, %s629_s15 }
  0x2c   :  { %p636_p8 = por %p635_p7, %p634_p6 }
  0x2e   :  { %p637_p9 = pnand %p636_p8, %p630_p5 }
  0x30   :  { %640 = shalt.err (!%p637_p9)
}
  0x31   :  { %55 = dma.hbm_to_vmem [thread:$0]  %s797_s5, 1024, %s50_s28, [#allocation5], %s647_s13, %s647_s13, %s648_s14  }
  0x32   :  { %641 = dma.done.wait [#allocation3], 1024  }
  0x33   :  { %642 = vsyncadd [#allocation3], 4294966272 }
  0x34   :  { %643 = dma.done.wait [#allocation5], 2048  }
  0x35   :  { %644 = vsyncadd [#allocation5], 4294965248  ;;  %v650_v0 = vmov 0.0   ;;  %vm651_vm0 = vmmov 0   ;;  %v550_v1 = vld [vmem:[#allocation2] sm:$0xff]   ;;  %v551_v2 = vld [vmem:[#allocation2 + $0x8] sm:$0xff]  }
  0x36   :  { %483 = vmatprep.subr.bf16.mxu0 %v650_v0  ;;  %499 = vmatprep.mubr.msk.bf16.mxu0 %vm651_vm0, %v650_v0  ;;  %v552_v3 = vld [vmem:[#allocation2 + $0x10] sm:$0xff]   ;;  %v559_v4 = vld [vmem:[#allocation4] sm:$0xff]   ;;  %v553_v5 = vld [vmem:[#allocation2 + $0x18] sm:$0xff]  }
  0x37   :  { %503 = vmatprep.subr.bf16.mxu1 %v650_v0  ;;  %519 = vmatprep.mubr.msk.bf16.mxu1 %vm651_vm0, %v650_v0  ;;  %v560_v6 = vld [vmem:[#allocation4 + $0x8] sm:$0xff]   ;;  %v554_v7 = vld [vmem:[#allocation2 + $0x20] sm:$0xff]   ;;  %v561_v8 = vld [vmem:[#allocation4 + $0x10] sm:$0xff]  }
  0x38   :  { %484 = vmatpush3.bf16.msra.mxu0 %v550_v1  ;;  %504 = vmatpush3.bf16.msra.mxu1 %v559_v4  ;;  %v555_v9 = vld [vmem:[#allocation2 + $0x28] sm:$0xff]   ;;  %v562_v10 = vld [vmem:[#allocation4 + $0x18] sm:$0xff]   ;;  %v556_v11 = vld [vmem:[#allocation2 + $0x30] sm:$0xff]  }
  0x39   :  { %485 = vmatprep.subr.bf16.mxu0 %v650_v0  ;;  %505 = vmatprep.subr.bf16.mxu1 %v650_v0  ;;  %v563_v12 = vld [vmem:[#allocation4 + $0x20] sm:$0xff]   ;;  %v557_v13 = vld [vmem:[#allocation2 + $0x38] sm:$0xff]   ;;  %v564_v14 = vld [vmem:[#allocation4 + $0x28] sm:$0xff]  }
  0x3a   :  { %v558_v15 = vld [vmem:[%s792_s0] sm:$0xff]   ;;  %v565_v16 = vld [vmem:[#allocation4 + $0x30] sm:$0xff]   ;;  %v566_v17 = vld [vmem:[#allocation4 + $0x38] sm:$0xff]  }
  0x3b   :  { %v567_v18 = vld [vmem:[#allocation6] sm:$0xff]   ;;  %v568_v19 = vld [vmem:[#allocation6 + $0x8] sm:$0xff]   ;;  %v569_v20 = vld [vmem:[#allocation6 + $0x10] sm:$0xff]  }
  0x3c   :  { %486 = vmatpush3.bf16.msra.mxu0 %v551_v2  ;;  %506 = vmatpush3.bf16.msra.mxu1 %v560_v6  ;;  %v570_v21 = vld [vmem:[#allocation6 + $0x18] sm:$0xff]   ;;  %v571_v22 = vld [vmem:[#allocation6 + $0x20] sm:$0xff]   ;;  %v572_v23 = vld [vmem:[#allocation6 + $0x28] sm:$0xff]  }
  0x3d   :  { %487 = vmatprep.subr.bf16.mxu0 %v650_v0  ;;  %507 = vmatprep.subr.bf16.mxu1 %v650_v0  ;;  %v428_v24 = vld [vmem:[%s794_s2] ss:$0 sm:$0xff]  ;;  %v573_v34 = vld [vmem:[#allocation6 + $0x30] sm:$0xff]   ;;  %v574_v35 = vld [vmem:[#allocation6 + $0x38] sm:$0xff]  }
  0x3e   :  { %v438_v36 = vld [vmem:[%s796_s4] ss:$0 sm:$0xff] }
  0x3f   :  { %v447_v46 = vld [vmem:[%s798_s6] ss:$0 sm:$0xff] }
  0x40   :  { %488 = vmatpush3.bf16.msra.mxu0 %v552_v3  ;;  %508 = vmatpush3.bf16.msra.mxu1 %v561_v8 }
  0x41   :  { %489 = vmatprep.subr.bf16.mxu0 %v650_v0  ;;  %509 = vmatprep.subr.bf16.mxu1 %v650_v0 }
  0x44   :  { %490 = vmatpush3.bf16.msra.mxu0 %v553_v5  ;;  %510 = vmatpush3.bf16.msra.mxu1 %v562_v10 }
  0x45   :  { %491 = vmatprep.subr.bf16.mxu0 %v650_v0  ;;  %511 = vmatprep.subr.bf16.mxu1 %v650_v0 }
  0x48   :  { %492 = vmatpush3.bf16.msra.mxu0 %v554_v7  ;;  %512 = vmatpush3.bf16.msra.mxu1 %v563_v12 }
  0x49   :  { %493 = vmatprep.subr.bf16.mxu0 %v650_v0  ;;  %513 = vmatprep.subr.bf16.mxu1 %v650_v0 }
  0x4c   :  { %494 = vmatpush3.bf16.msra.mxu0 %v555_v9  ;;  %514 = vmatpush3.bf16.msra.mxu1 %v564_v14 }
  0x4d   :  { %495 = vmatprep.subr.bf16.mxu0 %v650_v0  ;;  %515 = vmatprep.subr.bf16.mxu1 %v650_v0 }
  0x50   :  { %496 = vmatpush3.bf16.msra.mxu0 %v556_v11  ;;  %516 = vmatpush3.bf16.msra.mxu1 %v565_v16 }
  0x51   :  { %497 = vmatprep.subr.bf16.mxu0 %v650_v0  ;;  %517 = vmatprep.subr.bf16.mxu1 %v650_v0 }
  0x54   :  { %498 = vmatpush3.bf16.msra.mxu0 %v557_v13  ;;  %518 = vmatpush3.bf16.msra.mxu1 %v566_v17 }
  0x55   :  { %523 = vmatprep.subr.bf16.mxu0 %v650_v0 }
  0x57   :  { %500 = vmatmul.mubr.bf16.vlgmr.msra.gmra.mrb[0].mxu0 %v558_v15 }
  0x58   :  { %539 = vmatprep.mubr.msk.bf16.mxu0 %vm651_vm0, %v650_v0  ;;  %524 = vmatpush3.bf16.msra.mxu0 %v567_v18 }
  0x59   :  { %525 = vmatprep.subr.bf16.mxu0 %v650_v0 }
  0x5c   :  { %526 = vmatpush3.bf16.msra.mxu0 %v568_v19 }
  0x5d   :  { %527 = vmatprep.subr.bf16.mxu0 %v650_v0 }
  0x60   :  { %528 = vmatpush3.bf16.msra.mxu0 %v569_v20 }
  0x61   :  { %529 = vmatprep.subr.bf16.mxu0 %v650_v0 }
  0x64   :  { %530 = vmatpush3.bf16.msra.mxu0 %v570_v21 }
  0x65   :  { %531 = vmatprep.subr.bf16.mxu0 %v650_v0 }
  0x68   :  { %532 = vmatpush3.bf16.msra.mxu0 %v571_v22 }
  0x69   :  { %533 = vmatprep.subr.bf16.mxu0 %v650_v0 }
  0x6c   :  { %534 = vmatpush3.bf16.msra.mxu0 %v572_v23 }
  0x6d   :  { %535 = vmatprep.subr.bf16.mxu0 %v650_v0 }
  0x70   :  { %536 = vmatpush3.bf16.msra.mxu0 %v573_v34 }
  0x71   :  { %537 = vmatprep.subr.bf16.mxu0 %v650_v0 }
  0x74   :  { %538 = vmatpush3.bf16.msra.mxu0 %v574_v35 }
 0x12a   :  { %v181_v25 = vpop.f32.mrb[0].mxu0 }
 0x12b   :  { %v182_v26 = vadd.f32 %v428_v24, %v181_v25  ;;  %v501_v27 = vpop.f32.mrb[1].mxu0 }
 0x12c   :  { %v184_v28 = vpop.f32.mrb[2].mxu0 }
 0x12d   :  { %v185_v29 = vadd.f32 %v428_v24, %v184_v28  ;;  %v502_v30 = vpop.f32.mrb[3].mxu0  ;;  %v188_v31 = vmax.f32 %v182_v26, 0.0 }
 0x12f   :  { %v189_v32 = vmax.f32 %v185_v29, 0.0 }
 0x131   :  { %v190_v33 = vpack.c.bf16 %v189_v32, %v188_v31 }
 0x133   :  { %520 = vmatmul.mubr.bf16.vlgmr.msra.gmra.mrb[0].mxu1 %v190_v33 }
 0x206   :  { %v296_v37 = vpop.f32.mrb[0].mxu1 }
 0x207   :  { %v297_v38 = vadd.f32 %v438_v36, %v296_v37  ;;  %v521_v39 = vpop.f32.mrb[1].mxu1 }
 0x208   :  { %v299_v40 = vpop.f32.mrb[2].mxu1 }
 0x209   :  { %v300_v41 = vadd.f32 %v438_v36, %v299_v40  ;;  %v522_v42 = vpop.f32.mrb[3].mxu1  ;;  %v303_v43 = vmax.f32 %v297_v38, 0.0 }
 0x20b   :  { %v304_v44 = vmax.f32 %v300_v41, 0.0 }
 0x20d   :  { %v305_v45 = vpack.c.bf16 %v304_v44, %v303_v43 }
 0x20f   :  { %540 = vmatmul.mubr.bf16.vlgmr.msra.gmra.mrb[4].mxu0 %v305_v45 }
 0x2e2   :  { %v411_v47 = vpop.f32.mrb[4].mxu0 }
 0x2e3   :  { %v412_v48 = vadd.f32 %v447_v46, %v411_v47  ;;  %v541_v49 = vpop.f32.mrb[5].mxu0 }
 0x2e4   :  { %v414_v50 = vpop.f32.mrb[6].mxu0 }
 0x2e5   :  { %v418_v51 = vmax.f32 %v412_v48, 0.0  ;;  %v415_v52 = vadd.f32 %v447_v46, %v414_v50  ;;  %v542_v53 = vpop.f32.mrb[7].mxu0 }
 0x2e7   :  { %420 = vst [vmem:[%s799_s7] sm:$0xff] %v418_v51  ;;  %v419_v54 = vmax.f32 %v415_v52, 0.0 }
 0x2e9   :  { %421 = vst [vmem:[%s799_s7 + $0x8] sm:$0xff] %v419_v54 }
 0x2ea   :  { %426 = vsyncpa [#allocation3], 1 }
 0x2eb   :  { %427 = vsyncpa [#allocation5], 1 }

</bundles_post_ra>
